<compile_context>
chip_gen: v7x
topology: tpu7x:2x2x1
jax: 0.10.0
libtpu: 0.0.40
codegen_flags: <defaults>
</compile_context>

<pallas_src>
import functools

import jax
import jax.numpy as jnp
from jax.experimental import pallas as pl
from jax.experimental.pallas import tpu as pltpu

_LANE = 128      # keep last dims multiples of this for lane-dense loads/stores
_SUBLANE = 16    # bf16 sublane packing; batch tile rows kept a multiple of this


def _round_up(n: int, m: int) -> int:
    return ((n + m - 1) // m) * m


def _mlp_kernel(x_ref, w1_ref, b1_ref, w2_ref, b2_ref, o_ref):
    # layer1: bf16 matmul on the MXU, f32 accumulation + f32 epilogue (bias, ReLU).
    h = jnp.dot(x_ref[...], w1_ref[...], preferred_element_type=jnp.float32)
    h = jnp.maximum(h + b1_ref[...], 0.0)            # (TB,H) + (1,H) broadcast, f32
    # layer2: cast activations back to the matmul dtype, accumulate in f32.
    o = jnp.dot(h.astype(w2_ref.dtype), w2_ref[...],
                preferred_element_type=jnp.float32)
    o = jnp.maximum(o + b2_ref[...], 0.0)            # f32 epilogue
    o_ref[...] = o.astype(o_ref.dtype)


@functools.partial(jax.jit, static_argnames=("block_b", "compute_dtype"))
def hierarchical_feature_processor(x, w1, b1, w2, b2, *,
                                   block_b: int = 256,
                                   compute_dtype=jnp.bfloat16):
    """Fused eval-mode forward of HierarchicalFeatureProcessor.

    x : (B, input_dim)
    w1: (input_dim, hidden_dim),  b1: (hidden_dim,) or (1, hidden_dim)
    w2: (hidden_dim, output_dim), b2: (output_dim,) or (1, output_dim)
    returns (B, output_dim) float32
    """
    B, in_dim = x.shape
    hid_dim = w1.shape[1]
    out_dim = w2.shape[1]
    b1 = b1.reshape(1, hid_dim)
    b2 = b2.reshape(1, out_dim)

    # Lane-dense padded feature dims (multiples of 128). Padded weight/bias
    # entries are zero, so the valid region of the result is unchanged.
    in_p = _round_up(in_dim, _LANE)
    hid_p = _round_up(hid_dim, _LANE)
    out_p = _round_up(out_dim, _LANE)

    # Batch tile: multiple of bf16 sublane packing, capped by block_b.
    tb = min(_round_up(block_b, _SUBLANE), _round_up(B, _SUBLANE))
    b_p = _round_up(B, tb)

    xp = jnp.zeros((b_p, in_p), compute_dtype).at[:B, :in_dim].set(
        x.astype(compute_dtype))
    w1p = jnp.zeros((in_p, hid_p), compute_dtype).at[:in_dim, :hid_dim].set(
        w1.astype(compute_dtype))
    b1p = jnp.zeros((1, hid_p), jnp.float32).at[:, :hid_dim].set(
        b1.astype(jnp.float32))
    w2p = jnp.zeros((hid_p, out_p), compute_dtype).at[:hid_dim, :out_dim].set(
        w2.astype(compute_dtype))
    b2p = jnp.zeros((1, out_p), jnp.float32).at[:, :out_dim].set(
        b2.astype(jnp.float32))

    grid = (b_p // tb,)
    out_padded = pl.pallas_call(
        _mlp_kernel,
        out_shape=jax.ShapeDtypeStruct((b_p, out_p), jnp.float32),
        grid_spec=pltpu.PrefetchScalarGridSpec(
            num_scalar_prefetch=0,
            grid=grid,
            in_specs=[
                pl.BlockSpec((tb, in_p), lambda i: (i, 0)),      # x: batch-tiled
                pl.BlockSpec((in_p, hid_p), lambda i: (0, 0)),   # w1: VMEM-resident
                pl.BlockSpec((1, hid_p), lambda i: (0, 0)),      # b1: VMEM-resident
                pl.BlockSpec((hid_p, out_p), lambda i: (0, 0)),  # w2: VMEM-resident
                pl.BlockSpec((1, out_p), lambda i: (0, 0)),      # b2: VMEM-resident
            ],
            out_specs=pl.BlockSpec((tb, out_p), lambda i: (i, 0)),
        ),
        compiler_params=pltpu.CompilerParams(
            dimension_semantics=("parallel",),   # batch tiles are independent (2 TCs on v7x)
            vmem_limit_bytes=48 * 1024 * 1024,   # headroom under v7x's 64 MiB VMEM
        ),
    )(xp, w1p, b1p, w2p, b2p)

    return out_padded[:B, :out_dim]


if __name__ == "__main__":
    # Small shapes consistent with the module's forward.
    batch, input_dim, hidden_dim, output_dim = 8, 32, 64, 16

    key = jax.random.PRNGKey(0)
    kx, k1, k2, k3, k4 = jax.random.split(key, 5)
    lim1 = 1.0 / jnp.sqrt(jnp.float32(input_dim))
    lim2 = 1.0 / jnp.sqrt(jnp.float32(hidden_dim))
    x = jax.random.normal(kx, (batch, input_dim), jnp.float32)
    w1 = jax.random.uniform(k1, (input_dim, hidden_dim), jnp.float32, -lim1, lim1)
    b1 = jax.random.uniform(k2, (hidden_dim,), jnp.float32, -lim1, lim1)
    w2 = jax.random.uniform(k3, (hidden_dim, output_dim), jnp.float32, -lim2, lim2)
    b2 = jax.random.uniform(k4, (output_dim,), jnp.float32, -lim2, lim2)

    out = hierarchical_feature_processor(x, w1, b1, w2, b2)
    out = jax.block_until_ready(out)
    assert out.shape == (batch, output_dim)
    assert out.dtype == jnp.float32

    # Reference computed with the same bf16-matmul / f32-accumulate recipe.
    xb, w1b, w2b = (a.astype(jnp.bfloat16) for a in (x, w1, w2))
    h_ref = jnp.maximum(
        jnp.dot(xb, w1b, preferred_element_type=jnp.float32) + b1[None, :], 0.0)
    ref = jnp.maximum(
        jnp.dot(h_ref.astype(jnp.bfloat16), w2b,
                preferred_element_type=jnp.float32) + b2[None, :], 0.0)
    assert jnp.allclose(out, ref, atol=1e-3, rtol=1e-3), float(
        jnp.max(jnp.abs(out - ref)))

    # Sanity check against the pure-f32 eval-mode forward (loose tol: bf16 inputs).
    ref_f32 = jnp.maximum(
        jnp.maximum(x @ w1 + b1[None, :], 0.0) @ w2 + b2[None, :], 0.0)
    assert jnp.allclose(out, ref_f32, atol=5e-2, rtol=5e-2)

    print("KERNEL_OK")
</pallas_src>

<mosaic_0001>
module attributes {stable_mosaic.version = 11 : i64} {
  func.func @_mlp_kernel(%arg0: i32, %arg1: memref<16x128xbf16, #tpu.memory_space<vmem>>, %arg2: memref<128x128xbf16, #tpu.memory_space<vmem>>, %arg3: memref<1x128xf32, #tpu.memory_space<vmem>>, %arg4: memref<128x128xbf16, #tpu.memory_space<vmem>>, %arg5: memref<1x128xf32, #tpu.memory_space<vmem>>, %arg6: memref<16x128xf32, #tpu.memory_space<vmem>>) attributes {dimension_semantics = [#tpu.dimension_semantics<parallel>], iteration_bounds = array<i64: 1>, scalar_prefetch = 0 : i64, scratch_operands = 0 : i64, tpu.core_type = #tpu.core_type<tc>, window_params = [{transform_indices = @transform_0, window_bounds = array<i64: 16, 128>}, {pipeline_mode = #tpu.pipeline_mode<synchronous>, transform_indices = @transform_1, window_bounds = array<i64: 128, 128>}, {pipeline_mode = #tpu.pipeline_mode<synchronous>, transform_indices = @transform_2, window_bounds = array<i64: 1, 128>}, {pipeline_mode = #tpu.pipeline_mode<synchronous>, transform_indices = @transform_3, window_bounds = array<i64: 128, 128>}, {pipeline_mode = #tpu.pipeline_mode<synchronous>, transform_indices = @transform_4, window_bounds = array<i64: 1, 128>}, {transform_indices = @transform_5, window_bounds = array<i64: 16, 128>}]} {
    %c0 = arith.constant 0 : index
    %c0_0 = arith.constant 0 : index
    %0 = vector.load %arg1[%c0, %c0_0] : memref<16x128xbf16, #tpu.memory_space<vmem>>, vector<16x128xbf16>
    %c0_1 = arith.constant 0 : index
    %c0_2 = arith.constant 0 : index
    %1 = vector.load %arg2[%c0_1, %c0_2] : memref<128x128xbf16, #tpu.memory_space<vmem>>, vector<128x128xbf16>
    %cst = arith.constant dense<0.000000e+00> : vector<16x128xf32>
    %2 = tpu.matmul %0, %1, %cst {dimension_numbers = #tpu.dot_dimension_numbers<[1], [0], [0], [1], [0, 0, 1, 1], [], []>} : vector<16x128xbf16>, vector<128x128xbf16>, vector<16x128xf32> -> vector<16x128xf32>
    %c0_3 = arith.constant 0 : index
    %c0_4 = arith.constant 0 : index
    %3 = vector.load %arg3[%c0_3, %c0_4] : memref<1x128xf32, #tpu.memory_space<vmem>>, vector<1x128xf32>
    %4 = vector.broadcast %3 : vector<1x128xf32> to vector<16x128xf32>
    %5 = arith.addf %2, %4 : vector<16x128xf32>
    %cst_5 = arith.constant 0.000000e+00 : f32
    %6 = vector.broadcast %cst_5 : f32 to vector<16x128xf32>
    %7 = arith.maximumf %5, %6 : vector<16x128xf32>
    %8 = arith.truncf %7 : vector<16x128xf32> to vector<16x128xbf16>
    %c0_6 = arith.constant 0 : index
    %c0_7 = arith.constant 0 : index
    %9 = vector.load %arg4[%c0_6, %c0_7] : memref<128x128xbf16, #tpu.memory_space<vmem>>, vector<128x128xbf16>
    %cst_8 = arith.constant dense<0.000000e+00> : vector<16x128xf32>
    %10 = tpu.matmul %8, %9, %cst_8 {dimension_numbers = #tpu.dot_dimension_numbers<[1], [0], [0], [1], [0, 0, 1, 1], [], []>} : vector<16x128xbf16>, vector<128x128xbf16>, vector<16x128xf32> -> vector<16x128xf32>
    %c0_9 = arith.constant 0 : index
    %c0_10 = arith.constant 0 : index
    %11 = vector.load %arg5[%c0_9, %c0_10] : memref<1x128xf32, #tpu.memory_space<vmem>>, vector<1x128xf32>
    %12 = vector.broadcast %11 : vector<1x128xf32> to vector<16x128xf32>
    %13 = arith.addf %10, %12 : vector<16x128xf32>
    %cst_11 = arith.constant 0.000000e+00 : f32
    %14 = vector.broadcast %cst_11 : f32 to vector<16x128xf32>
    %15 = arith.maximumf %13, %14 : vector<16x128xf32>
    %c0_12 = arith.constant 0 : index
    %c0_13 = arith.constant 0 : index
    %16 = vector.load %arg6[%c0_12, %c0_13] : memref<16x128xf32, #tpu.memory_space<vmem>>, vector<16x128xf32>
    tpu.vector_store %arg6[%c0_12, %c0_13], %15 {strides = array<i32>} : memref<16x128xf32, #tpu.memory_space<vmem>>, vector<16x128xf32>,
    return
  }
  func.func @transform_0(%arg0: i32) -> (i32, i32) {
    %c0_i32 = arith.constant 0 : i32
    %c0_i32_0 = arith.constant 0 : i32
    return %arg0, %c0_i32 : i32, i32
  }
  func.func @transform_1(%arg0: i32) -> (i32, i32) {
    %c0_i32 = arith.constant 0 : i32
    %c0_i32_0 = arith.constant 0 : i32
    %c0_i32_1 = arith.constant 0 : i32
    return %c0_i32, %c0_i32_0 : i32, i32
  }
  func.func @transform_2(%arg0: i32) -> (i32, i32) {
    %c0_i32 = arith.constant 0 : i32
    %c0_i32_0 = arith.constant 0 : i32
    %c0_i32_1 = arith.constant 0 : i32
    return %c0_i32, %c0_i32_0 : i32, i32
  }
  func.func @transform_3(%arg0: i32) -> (i32, i32) {
    %c0_i32 = arith.constant 0 : i32
    %c0_i32_0 = arith.constant 0 : i32
    %c0_i32_1 = arith.constant 0 : i32
    return %c0_i32, %c0_i32_0 : i32, i32
  }
  func.func @transform_4(%arg0: i32) -> (i32, i32) {
    %c0_i32 = arith.constant 0 : i32
    %c0_i32_0 = arith.constant 0 : i32
    %c0_i32_1 = arith.constant 0 : i32
    return %c0_i32, %c0_i32_0 : i32, i32
  }
  func.func @transform_5(%arg0: i32) -> (i32, i32) {
    %c0_i32 = arith.constant 0 : i32
    %c0_i32_0 = arith.constant 0 : i32
    return %arg0, %c0_i32 : i32, i32
  }
}

</mosaic_0001>

<bundles_post_ra>
// kernel: hierarchical_feature_processor.1
= control target key start
LH: loop header
LB: loop body
LE: loop exit
PB: predicated region body
PF: predicated region fallthrough
CT: control target
= control target key end

     0   :  { %v360_v0 = vmov 0.0   ;;  %vm361_vm0 = vmmov 0   ;;  %s455_s1 = inlined_call_operand.vmem [shape: bf16[128,128], index: 1, kind: input, shape index: {}]   ;;  %s456_s3 = inlined_call_operand.vmem [shape: bf16[128,128], index: 3, kind: input, shape index: {}]   ;;  %s457_s0 = inlined_call_operand.vmem [shape: bf16[16,128], index: 0, kind: input, shape index: {}]   ;;  %s458_s2 = inlined_call_operand.vmem [shape: f32[1,128], index: 2, kind: input, shape index: {}]   ;;  %s459_s4 = inlined_call_operand.vmem [shape: f32[1,128], index: 4, kind: input, shape index: {}]   ;;  %s460_s5 = inlined_call_operand.vmem [shape: f32[16,128], index: 5, kind: output, shape index: {}]  }
   0x1   :  { %301 = vmatprep.subr.bf16.mxu0 %v360_v0  ;;  %v343_v1 = vld [vmem:[%s455_s1] sm:$0xff]   ;;  %317 = vmatprep.mubr.msk.bf16.mxu0 %vm361_vm0, %v360_v0  ;;  %v344_v2 = vld [vmem:[%s455_s1 + $0x8] sm:$0xff]   ;;  %v345_v3 = vld [vmem:[%s455_s1 + $0x10] sm:$0xff]  }
   0x2   :  { %321 = vmatprep.subr.bf16.mxu1 %v360_v0  ;;  %337 = vmatprep.mubr.msk.bf16.mxu1 %vm361_vm0, %v360_v0  ;;  %v352_v4 = vld [vmem:[%s456_s3] sm:$0xff]   ;;  %v346_v5 = vld [vmem:[%s455_s1 + $0x18] sm:$0xff]   ;;  %v353_v6 = vld [vmem:[%s456_s3 + $0x8] sm:$0xff]  }
   0x3   :  { %302 = vmatpush3.bf16.msra.mxu0 %v343_v1  ;;  %322 = vmatpush3.bf16.msra.mxu1 %v352_v4  ;;  %v347_v7 = vld [vmem:[%s455_s1 + $0x20] sm:$0xff]   ;;  %v354_v8 = vld [vmem:[%s456_s3 + $0x10] sm:$0xff]   ;;  %v348_v9 = vld [vmem:[%s455_s1 + $0x28] sm:$0xff]  }
   0x4   :  { %303 = vmatprep.subr.bf16.mxu0 %v360_v0  ;;  %323 = vmatprep.subr.bf16.mxu1 %v360_v0  ;;  %v355_v10 = vld [vmem:[%s456_s3 + $0x18] sm:$0xff]   ;;  %v349_v11 = vld [vmem:[%s455_s1 + $0x30] sm:$0xff]   ;;  %v356_v12 = vld [vmem:[%s456_s3 + $0x20] sm:$0xff]  }
   0x5   :  { %v350_v13 = vld [vmem:[%s455_s1 + $0x38] sm:$0xff]   ;;  %v357_v14 = vld [vmem:[%s456_s3 + $0x28] sm:$0xff]   ;;  %v351_v15 = vld [vmem:[%s457_s0] sm:$0xff]  }
   0x6   :  { %v358_v16 = vld [vmem:[%s456_s3 + $0x30] sm:$0xff]   ;;  %v359_v17 = vld [vmem:[%s456_s3 + $0x38] sm:$0xff]   ;;  %v264_v18 = vld [vmem:[%s458_s2] ss:$0 sm:$0xff] }
   0x7   :  { %304 = vmatpush3.bf16.msra.mxu0 %v344_v2  ;;  %324 = vmatpush3.bf16.msra.mxu1 %v353_v6  ;;  %v274_v28 = vld [vmem:[%s459_s4] ss:$0 sm:$0xff] }
   0x8   :  { %305 = vmatprep.subr.bf16.mxu0 %v360_v0  ;;  %325 = vmatprep.subr.bf16.mxu1 %v360_v0 }
   0xb   :  { %306 = vmatpush3.bf16.msra.mxu0 %v345_v3  ;;  %326 = vmatpush3.bf16.msra.mxu1 %v354_v8 }
   0xc   :  { %307 = vmatprep.subr.bf16.mxu0 %v360_v0  ;;  %327 = vmatprep.subr.bf16.mxu1 %v360_v0 }
   0xf   :  { %308 = vmatpush3.bf16.msra.mxu0 %v346_v5  ;;  %328 = vmatpush3.bf16.msra.mxu1 %v355_v10 }
  0x10   :  { %309 = vmatprep.subr.bf16.mxu0 %v360_v0  ;;  %329 = vmatprep.subr.bf16.mxu1 %v360_v0 }
  0x13   :  { %310 = vmatpush3.bf16.msra.mxu0 %v347_v7  ;;  %330 = vmatpush3.bf16.msra.mxu1 %v356_v12 }
  0x14   :  { %311 = vmatprep.subr.bf16.mxu0 %v360_v0  ;;  %331 = vmatprep.subr.bf16.mxu1 %v360_v0 }
  0x17   :  { %312 = vmatpush3.bf16.msra.mxu0 %v348_v9  ;;  %332 = vmatpush3.bf16.msra.mxu1 %v357_v14 }
  0x18   :  { %313 = vmatprep.subr.bf16.mxu0 %v360_v0  ;;  %333 = vmatprep.subr.bf16.mxu1 %v360_v0 }
  0x1b   :  { %314 = vmatpush3.bf16.msra.mxu0 %v349_v11  ;;  %334 = vmatpush3.bf16.msra.mxu1 %v358_v16 }
  0x1c   :  { %315 = vmatprep.subr.bf16.mxu0 %v360_v0  ;;  %335 = vmatprep.subr.bf16.mxu1 %v360_v0 }
  0x1f   :  { %316 = vmatpush3.bf16.msra.mxu0 %v350_v13  ;;  %336 = vmatpush3.bf16.msra.mxu1 %v359_v17 }
  0x22   :  { %318 = vmatmul.mubr.bf16.vlgmr.msra.gmra.mrb[0].mxu0 %v351_v15 }
  0xf5   :  { %v134_v19 = vpop.f32.mrb[0].mxu0 }
  0xf6   :  { %v135_v20 = vadd.f32 %v264_v18, %v134_v19  ;;  %v319_v21 = vpop.f32.mrb[1].mxu0 }
  0xf7   :  { %v137_v22 = vpop.f32.mrb[2].mxu0 }
  0xf8   :  { %v138_v23 = vadd.f32 %v264_v18, %v137_v22  ;;  %v320_v24 = vpop.f32.mrb[3].mxu0  ;;  %v141_v25 = vmax.f32 %v135_v20, 0.0 }
  0xfa   :  { %v142_v26 = vmax.f32 %v138_v23, 0.0 }
  0xfc   :  { %v143_v27 = vpack.c.bf16 %v142_v26, %v141_v25 }
  0xfe   :  { %338 = vmatmul.mubr.bf16.vlgmr.msra.gmra.mrb[0].mxu1 %v143_v27 }
 0x1d1   :  { %v249_v29 = vpop.f32.mrb[0].mxu1 }
 0x1d2   :  { %v250_v30 = vadd.f32 %v274_v28, %v249_v29  ;;  %v339_v31 = vpop.f32.mrb[1].mxu1 }
 0x1d3   :  { %v252_v32 = vpop.f32.mrb[2].mxu1 }
 0x1d4   :  { %v256_v33 = vmax.f32 %v250_v30, 0.0  ;;  %v253_v34 = vadd.f32 %v274_v28, %v252_v32  ;;  %v340_v35 = vpop.f32.mrb[3].mxu1 }
 0x1d6   :  { %258 = vst [vmem:[%s460_s5] sm:$0xff] %v256_v33  ;;  %v257_v36 = vmax.f32 %v253_v34, 0.0 }
 0x1d8   :  { %259 = vst [vmem:[%s460_s5 + $0x8] sm:$0xff] %v257_v36 }

</bundles_post_ra>
